<compile_context>
chip_gen: v7x
topology: tpu7x:2x2x1
jax: 0.10.0
libtpu: 0.0.40
codegen_flags: <defaults>
</compile_context>

<pallas_src>
import functools

import jax
import jax.numpy as jnp
from jax import lax
from jax.experimental import pallas as pl
from jax.experimental.pallas import tpu as pltpu


def _choose_tile(s, cap):
    """Largest tile <= cap that divides s (multiples of 8); else full extent.

    The full-extent fallback is always a legal block shape; for huge prime-ish
    S it trades VMEM for correctness rather than failing (see review note).
    """
    for t in (512, 256, 128, 64, 32, 16, 8):
        if t <= cap and t <= s and s % t == 0:
            return t
    return s


def _vmem_limit_bytes():
    """Scoped-VMEM limit derived from physical VMEM (v5e/v6e: 128 MiB, v7x: 64 MiB)."""
    cap = 64 * 1024 * 1024
    try:
        cap = int(pltpu.get_tpu_info().vmem_capacity_bytes)
    except Exception:
        pass
    return max(32 * 1024 * 1024, min(96 * 1024 * 1024, (cap * 3) // 4))


# ----------------------------- pass 1: QKV projection -----------------------------


def _qkv_proj_kernel(x_ref, w_q_ref, b_q_ref, w_k_ref, b_k_ref, w_v_ref, b_v_ref,
                     q_ref, k_ref, v_ref):
    """One (batch, seq-tile, head) step: project x tile into Q/K/V for this head."""
    x = x_ref[0]                                                          # (TS, E)
    q = jnp.dot(x, w_q_ref[0], preferred_element_type=jnp.float32) + b_q_ref[0]
    k = jnp.dot(x, w_k_ref[0], preferred_element_type=jnp.float32) + b_k_ref[0]
    v = jnp.dot(x, w_v_ref[0], preferred_element_type=jnp.float32) + b_v_ref[0]
    q_ref[0, 0] = q.astype(q_ref.dtype)                                   # (TS, D)
    k_ref[0, 0] = k.astype(k_ref.dtype)
    v_ref[0, 0] = v.astype(v_ref.dtype)


# --------------------- pass 2: flash attention + output proj ----------------------


def _flash_kernel(q_ref, k_ref, v_ref, w_o_ref, b_o_ref, o_ref,
                  m_s, l_s, acc_s, out_s, *, compute_dtype, approx_recip):
    h = pl.program_id(2)
    ik = pl.program_id(3)
    n_h = pl.num_programs(2)
    n_k = pl.num_programs(3)

    # Zero the per-(batch, q-tile) output accumulator at the very first step.
    @pl.when(jnp.logical_and(h == 0, ik == 0))
    def _():
        out_s[...] = jnp.zeros(out_s.shape, out_s.dtype)

    # Per-head flash-softmax state init.
    @pl.when(ik == 0)
    def _():
        m_s[...] = jnp.full(m_s.shape, -jnp.inf, m_s.dtype)
        l_s[...] = jnp.zeros(l_s.shape, l_s.dtype)
        acc_s[...] = jnp.zeros(acc_s.shape, acc_s.dtype)

    q = q_ref[0, 0]                                                       # (TQ, D) bf16
    k = k_ref[0, 0]                                                       # (TK, D) bf16
    v = v_ref[0, 0]                                                       # (TK, D) bf16

    # Scores: contract head_dim of both operands -- no explicit k.T / XLU transpose.
    s = lax.dot_general(q, k,
                        dimension_numbers=(((1,), (1,)), ((), ())),
                        preferred_element_type=jnp.float32)               # (TQ, TK)

    # Online (flash) softmax update, all statistics in f32.
    m_new = jnp.maximum(m_s[...], jnp.max(s, axis=-1, keepdims=True))
    alpha = jnp.exp(m_s[...] - m_new)
    p = jnp.exp(s - m_new)                                                # (TQ, TK)
    l_s[...] = alpha * l_s[...] + jnp.sum(p, axis=-1, keepdims=True)
    acc_s[...] = alpha * acc_s[...] + jnp.dot(
        p.astype(compute_dtype), v, preferred_element_type=jnp.float32)   # (TQ, D)
    m_s[...] = m_new

    # Finalize this head: fold the context straight into the output projection.
    @pl.when(ik == n_k - 1)
    def _():
        ctx = acc_s[...] * pl.reciprocal(l_s[...], approx=approx_recip)   # (TQ, D)
        out_s[...] += jnp.dot(ctx.astype(compute_dtype), w_o_ref[0],
                              preferred_element_type=jnp.float32)         # (TQ, E)

    # Last head, last KV tile: add output bias and write the (TQ, E) block.
    @pl.when(jnp.logical_and(h == n_h - 1, ik == n_k - 1))
    def _():
        o_ref[0] = (out_s[...] + b_o_ref[...]).astype(o_ref.dtype)


# ----------------------------------- wrapper --------------------------------------


def mha_forward(x, w_qkv, b_qkv, w_out, b_out, *, num_heads,
                compute_dtype=jnp.bfloat16, approx_recip=True,
                q_tile=256, kv_tile=512, proj_tile=512):
    """x: (B, S, E); w_qkv: (E, 3E); b_qkv: (3E,); w_out: (E, E); b_out: (E,).

    Weights use the (in_features, out_features) convention (already transposed
    relative to PyTorch's nn.Linear.weight).  approx_recip=True uses the EUP
    approximate reciprocal (fast path); set False for strict parity checks.
    """
    B, S, E = x.shape
    assert E % num_heads == 0
    H = num_heads
    D = E // H
    scale = D ** (-0.5)

    ts = _choose_tile(S, proj_tile)
    tq = _choose_tile(S, q_tile)
    tk = _choose_tile(S, kv_tile)
    ns, nq, nk = S // ts, S // tq, S // tk

    # ---- operand prep: pre-cast all streamed operands to compute_dtype ----
    x_c = x.astype(compute_dtype)
    w_q = (w_qkv[:, 0 * E:1 * E] * scale).reshape(E, H, D).transpose(1, 0, 2).astype(compute_dtype)
    w_k = w_qkv[:, 1 * E:2 * E].reshape(E, H, D).transpose(1, 0, 2).astype(compute_dtype)
    w_v = w_qkv[:, 2 * E:3 * E].reshape(E, H, D).transpose(1, 0, 2).astype(compute_dtype)
    b_q = (b_qkv[0 * E:1 * E] * scale).reshape(H, 1, D).astype(jnp.float32)
    b_k = b_qkv[1 * E:2 * E].reshape(H, 1, D).astype(jnp.float32)
    b_v = b_qkv[2 * E:3 * E].reshape(H, 1, D).astype(jnp.float32)
    w_o = w_out.reshape(H, D, E).astype(compute_dtype)   # rows of w_out ordered [head, dim]
    b_o = b_out.reshape(1, E).astype(jnp.float32)

    vmem_limit = _vmem_limit_bytes()

    # ---- pass 1: QKV projection -> (B, H, S, D) in compute_dtype ----
    head_w_spec = pl.BlockSpec((1, E, D), lambda b, i, h: (h, 0, 0))
    head_b_spec = pl.BlockSpec((1, 1, D), lambda b, i, h: (h, 0, 0))
    qkv_out_spec = pl.BlockSpec((1, 1, ts, D), lambda b, i, h: (b, h, i, 0))
    qkv_shape = jax.ShapeDtypeStruct((B, H, S, D), compute_dtype)

    q_all, k_all, v_all = pl.pallas_call(
        _qkv_proj_kernel,
        out_shape=(qkv_shape, qkv_shape, qkv_shape),
        grid_spec=pltpu.PrefetchScalarGridSpec(
            num_scalar_prefetch=0,
            grid=(B, ns, H),
            in_specs=[
                pl.BlockSpec((1, ts, E), lambda b, i, h: (b, i, 0)),  # x tile (resident across h)
                head_w_spec, head_b_spec,                              # Q weights/bias (scaled)
                head_w_spec, head_b_spec,                              # K
                head_w_spec, head_b_spec,                              # V
            ],
            out_specs=[qkv_out_spec, qkv_out_spec, qkv_out_spec],
        ),
        compiler_params=pltpu.CompilerParams(
            dimension_semantics=("parallel", "parallel", "arbitrary"),
            vmem_limit_bytes=vmem_limit,
        ),
    )(x_c, w_q, b_q, w_k, b_k, w_v, b_v)

    # ---- pass 2: flash attention with fused per-head output projection ----
    kernel = functools.partial(_flash_kernel,
                               compute_dtype=compute_dtype,
                               approx_recip=approx_recip)

    return pl.pallas_call(
        kernel,
        out_shape=jax.ShapeDtypeStruct((B, S, E), x.dtype),
        grid_spec=pltpu.PrefetchScalarGridSpec(
            num_scalar_prefetch=0,
            grid=(B, nq, H, nk),
            in_specs=[
                pl.BlockSpec((1, 1, tq, D), lambda b, iq, h, ik: (b, h, iq, 0)),  # Q tile
                pl.BlockSpec((1, 1, tk, D), lambda b, iq, h, ik: (b, h, ik, 0)),  # K tile
                pl.BlockSpec((1, 1, tk, D), lambda b, iq, h, ik: (b, h, ik, 0)),  # V tile
                pl.BlockSpec((1, D, E), lambda b, iq, h, ik: (h, 0, 0)),          # w_o per head
                pl.BlockSpec((1, E), lambda b, iq, h, ik: (0, 0)),                # b_o
            ],
            out_specs=pl.BlockSpec((1, tq, E), lambda b, iq, h, ik: (b, iq, 0)),
            scratch_shapes=[
                pltpu.VMEM((tq, 1), jnp.float32),     # running max
                pltpu.VMEM((tq, 1), jnp.float32),     # running sum
                pltpu.VMEM((tq, D), jnp.float32),     # per-head context accumulator
                pltpu.VMEM((tq, E), jnp.float32),     # output-projection accumulator
            ],
        ),
        compiler_params=pltpu.CompilerParams(
            # NOTE: the head axis must stay "arbitrary": out_s / o_ref accumulate across h.
            dimension_semantics=("parallel", "parallel", "arbitrary", "arbitrary"),
            vmem_limit_bytes=vmem_limit,
        ),
    )(q_all, k_all, v_all, w_o, b_o)


def mha_reference(x, w_qkv, b_qkv, w_out, b_out, *, num_heads):
    """Pure-JAX reference mirroring the PyTorch forward exactly."""
    B, S, E = x.shape
    D = E // num_heads
    scale = D ** (-0.5)
    qkv = x @ w_qkv + b_qkv                                # (B, S, 3E)
    qkv = qkv.reshape(B, S, 3, num_heads, D).transpose(2, 0, 3, 1, 4)
    q, k, v = qkv[0], qkv[1], qkv[2]                       # (B, H, S, D)
    attn = (q @ jnp.swapaxes(k, -1, -2)) * scale
    attn = jax.nn.softmax(attn, axis=-1)
    out = (attn @ v).transpose(0, 2, 1, 3).reshape(B, S, E)
    return out @ w_out + b_out


if __name__ == "__main__":
    B, S, E, H = 2, 8, 32, 4

    key = jax.random.PRNGKey(0)
    kx, k1, k2, k3, k4 = jax.random.split(key, 5)

    x = jax.random.normal(kx, (B, S, E), dtype=jnp.float32)

    # Deterministic nn.Linear-style init; weights stored as (in, out).
    bound = 1.0 / (E ** 0.5)
    w_qkv = jax.random.uniform(k1, (E, 3 * E), jnp.float32, -bound, bound)
    b_qkv = jax.random.uniform(k2, (3 * E,), jnp.float32, -bound, bound)
    w_out = jax.random.uniform(k3, (E, E), jnp.float32, -bound, bound)
    b_out = jax.random.uniform(k4, (E,), jnp.float32, -bound, bound)

    ref = mha_reference(x, w_qkv, b_qkv, w_out, b_out, num_heads=H)

    # 1) Strict check: f32 MXU operands + exact reciprocal validates the fused
    #    two-pass flash structure against the reference at 1e-4.
    out_f32 = mha_forward(x, w_qkv, b_qkv, w_out, b_out, num_heads=H,
                          compute_dtype=jnp.float32, approx_recip=False)
    out_f32 = jax.block_until_ready(out_f32)
    assert out_f32.shape == (B, S, E)
    assert jnp.allclose(out_f32, ref, atol=1e-4, rtol=1e-4)

    # 2) Default fast path: bf16 operands everywhere + EUP approx reciprocal.
    out_fast = mha_forward(x, w_qkv, b_qkv, w_out, b_out, num_heads=H)
    out_fast = jax.block_until_ready(out_fast)
    assert jnp.allclose(out_fast, ref, atol=5e-2, rtol=5e-2)

    print("KERNEL_OK")
</pallas_src>

<mosaic_0001>
module attributes {stable_mosaic.version = 11 : i64} {
  func.func @_qkv_proj_kernel(%arg0: i32, %arg1: i32, %arg2: i32, %arg3: memref<1x8x32xf32, #tpu.memory_space<vmem>>, %arg4: memref<1x32x8xf32, #tpu.memory_space<vmem>>, %arg5: memref<1x1x8xf32, #tpu.memory_space<vmem>>, %arg6: memref<1x32x8xf32, #tpu.memory_space<vmem>>, %arg7: memref<1x1x8xf32, #tpu.memory_space<vmem>>, %arg8: memref<1x32x8xf32, #tpu.memory_space<vmem>>, %arg9: memref<1x1x8xf32, #tpu.memory_space<vmem>>, %arg10: memref<1x1x8x8xf32, #tpu.memory_space<vmem>>, %arg11: memref<1x1x8x8xf32, #tpu.memory_space<vmem>>, %arg12: memref<1x1x8x8xf32, #tpu.memory_space<vmem>>) attributes {dimension_semantics = [#tpu.dimension_semantics<parallel>, #tpu.dimension_semantics<parallel>, #tpu.dimension_semantics<arbitrary>], iteration_bounds = array<i64: 2, 1, 4>, scalar_prefetch = 0 : i64, scratch_operands = 0 : i64, tpu.core_type = #tpu.core_type<tc>, window_params = [{transform_indices = @transform_0, window_bounds = array<i64: 1, 8, 32>}, {transform_indices = @transform_1, window_bounds = array<i64: 1, 32, 8>}, {transform_indices = @transform_2, window_bounds = array<i64: 1, 1, 8>}, {transform_indices = @transform_3, window_bounds = array<i64: 1, 32, 8>}, {transform_indices = @transform_4, window_bounds = array<i64: 1, 1, 8>}, {transform_indices = @transform_5, window_bounds = array<i64: 1, 32, 8>}, {transform_indices = @transform_6, window_bounds = array<i64: 1, 1, 8>}, {transform_indices = @transform_7, window_bounds = array<i64: 1, 1, 8, 8>}, {transform_indices = @transform_8, window_bounds = array<i64: 1, 1, 8, 8>}, {transform_indices = @transform_9, window_bounds = array<i64: 1, 1, 8, 8>}]} {
    %c0 = arith.constant 0 : index
    %c0_0 = arith.constant 0 : index
    %c0_1 = arith.constant 0 : index
    %0 = vector.load %arg3[%c0, %c0_0, %c0_1] : memref<1x8x32xf32, #tpu.memory_space<vmem>>, vector<1x8x32xf32>
    %1 = vector.shape_cast %0 : vector<1x8x32xf32> to vector<8x32xf32>
    %c0_2 = arith.constant 0 : index
    %c0_3 = arith.constant 0 : index
    %c0_4 = arith.constant 0 : index
    %2 = vector.load %arg4[%c0_2, %c0_3, %c0_4] : memref<1x32x8xf32, #tpu.memory_space<vmem>>, vector<1x32x8xf32>
    %3 = vector.shape_cast %2 : vector<1x32x8xf32> to vector<32x8xf32>
    %cst = arith.constant dense<0.000000e+00> : vector<8x8xf32>
    %4 = tpu.matmul %1, %3, %cst {dimension_numbers = #tpu.dot_dimension_numbers<[1], [0], [0], [1], [0, 0, 1, 1], [], []>} : vector<8x32xf32>, vector<32x8xf32>, vector<8x8xf32> -> vector<8x8xf32>
    %c0_5 = arith.constant 0 : index
    %c0_6 = arith.constant 0 : index
    %c0_7 = arith.constant 0 : index
    %5 = vector.load %arg5[%c0_5, %c0_6, %c0_7] : memref<1x1x8xf32, #tpu.memory_space<vmem>>, vector<1x1x8xf32>
    %6 = vector.shape_cast %5 : vector<1x1x8xf32> to vector<1x8xf32>
    %7 = vector.broadcast %6 : vector<1x8xf32> to vector<8x8xf32>
    %8 = arith.addf %4, %7 : vector<8x8xf32>
    %c0_8 = arith.constant 0 : index
    %c0_9 = arith.constant 0 : index
    %c0_10 = arith.constant 0 : index
    %9 = vector.load %arg6[%c0_8, %c0_9, %c0_10] : memref<1x32x8xf32, #tpu.memory_space<vmem>>, vector<1x32x8xf32>
    %10 = vector.shape_cast %9 : vector<1x32x8xf32> to vector<32x8xf32>
    %cst_11 = arith.constant dense<0.000000e+00> : vector<8x8xf32>
    %11 = tpu.matmul %1, %10, %cst_11 {dimension_numbers = #tpu.dot_dimension_numbers<[1], [0], [0], [1], [0, 0, 1, 1], [], []>} : vector<8x32xf32>, vector<32x8xf32>, vector<8x8xf32> -> vector<8x8xf32>
    %c0_12 = arith.constant 0 : index
    %c0_13 = arith.constant 0 : index
    %c0_14 = arith.constant 0 : index
    %12 = vector.load %arg7[%c0_12, %c0_13, %c0_14] : memref<1x1x8xf32, #tpu.memory_space<vmem>>, vector<1x1x8xf32>
    %13 = vector.shape_cast %12 : vector<1x1x8xf32> to vector<1x8xf32>
    %14 = vector.broadcast %13 : vector<1x8xf32> to vector<8x8xf32>
    %15 = arith.addf %11, %14 : vector<8x8xf32>
    %c0_15 = arith.constant 0 : index
    %c0_16 = arith.constant 0 : index
    %c0_17 = arith.constant 0 : index
    %16 = vector.load %arg8[%c0_15, %c0_16, %c0_17] : memref<1x32x8xf32, #tpu.memory_space<vmem>>, vector<1x32x8xf32>
    %17 = vector.shape_cast %16 : vector<1x32x8xf32> to vector<32x8xf32>
    %cst_18 = arith.constant dense<0.000000e+00> : vector<8x8xf32>
    %18 = tpu.matmul %1, %17, %cst_18 {dimension_numbers = #tpu.dot_dimension_numbers<[1], [0], [0], [1], [0, 0, 1, 1], [], []>} : vector<8x32xf32>, vector<32x8xf32>, vector<8x8xf32> -> vector<8x8xf32>
    %c0_19 = arith.constant 0 : index
    %c0_20 = arith.constant 0 : index
    %c0_21 = arith.constant 0 : index
    %19 = vector.load %arg9[%c0_19, %c0_20, %c0_21] : memref<1x1x8xf32, #tpu.memory_space<vmem>>, vector<1x1x8xf32>
    %20 = vector.shape_cast %19 : vector<1x1x8xf32> to vector<1x8xf32>
    %21 = vector.broadcast %20 : vector<1x8xf32> to vector<8x8xf32>
    %22 = arith.addf %18, %21 : vector<8x8xf32>
    %c0_22 = arith.constant 0 : index
    %c0_23 = arith.constant 0 : index
    %c0_24 = arith.constant 0 : index
    %c0_25 = arith.constant 0 : index
    %23 = vector.load %arg10[%c0_22, %c0_23, %c0_24, %c0_25] : memref<1x1x8x8xf32, #tpu.memory_space<vmem>>, vector<1x1x8x8xf32>
    %24 = vector.shape_cast %23 : vector<1x1x8x8xf32> to vector<8x8xf32>
    %25 = vector.shape_cast %8 : vector<8x8xf32> to vector<1x1x8x8xf32>
    tpu.vector_store %arg10[%c0_22, %c0_23, %c0_24, %c0_25], %25 {strides = array<i32>} : memref<1x1x8x8xf32, #tpu.memory_space<vmem>>, vector<1x1x8x8xf32>,
    %c0_26 = arith.constant 0 : index
    %c0_27 = arith.constant 0 : index
    %c0_28 = arith.constant 0 : index
    %c0_29 = arith.constant 0 : index
    %26 = vector.load %arg11[%c0_26, %c0_27, %c0_28, %c0_29] : memref<1x1x8x8xf32, #tpu.memory_space<vmem>>, vector<1x1x8x8xf32>
    %27 = vector.shape_cast %26 : vector<1x1x8x8xf32> to vector<8x8xf32>
    %28 = vector.shape_cast %15 : vector<8x8xf32> to vector<1x1x8x8xf32>
    tpu.vector_store %arg11[%c0_26, %c0_27, %c0_28, %c0_29], %28 {strides = array<i32>} : memref<1x1x8x8xf32, #tpu.memory_space<vmem>>, vector<1x1x8x8xf32>,
    %c0_30 = arith.constant 0 : index
    %c0_31 = arith.constant 0 : index
    %c0_32 = arith.constant 0 : index
    %c0_33 = arith.constant 0 : index
    %29 = vector.load %arg12[%c0_30, %c0_31, %c0_32, %c0_33] : memref<1x1x8x8xf32, #tpu.memory_space<vmem>>, vector<1x1x8x8xf32>
    %30 = vector.shape_cast %29 : vector<1x1x8x8xf32> to vector<8x8xf32>
    %31 = vector.shape_cast %22 : vector<8x8xf32> to vector<1x1x8x8xf32>
    tpu.vector_store %arg12[%c0_30, %c0_31, %c0_32, %c0_33], %31 {strides = array<i32>} : memref<1x1x8x8xf32, #tpu.memory_space<vmem>>, vector<1x1x8x8xf32>,
    return
  }
  func.func @transform_0(%arg0: i32, %arg1: i32, %arg2: i32) -> (i32, i32, i32) {
    %c0_i32 = arith.constant 0 : i32
    %c0_i32_0 = arith.constant 0 : i32
    return %arg0, %arg1, %c0_i32 : i32, i32, i32
  }
  func.func @transform_1(%arg0: i32, %arg1: i32, %arg2: i32) -> (i32, i32, i32) {
    %c0_i32 = arith.constant 0 : i32
    %c0_i32_0 = arith.constant 0 : i32
    %c0_i32_1 = arith.constant 0 : i32
    return %arg2, %c0_i32, %c0_i32_0 : i32, i32, i32
  }
  func.func @transform_2(%arg0: i32, %arg1: i32, %arg2: i32) -> (i32, i32, i32) {
    %c0_i32 = arith.constant 0 : i32
    %c0_i32_0 = arith.constant 0 : i32
    %c0_i32_1 = arith.constant 0 : i32
    return %arg2, %c0_i32, %c0_i32_0 : i32, i32, i32
  }
  func.func @transform_3(%arg0: i32, %arg1: i32, %arg2: i32) -> (i32, i32, i32) {
    %c0_i32 = arith.constant 0 : i32
    %c0_i32_0 = arith.constant 0 : i32
    %c0_i32_1 = arith.constant 0 : i32
    return %arg2, %c0_i32, %c0_i32_0 : i32, i32, i32
  }
  func.func @transform_4(%arg0: i32, %arg1: i32, %arg2: i32) -> (i32, i32, i32) {
    %c0_i32 = arith.constant 0 : i32
    %c0_i32_0 = arith.constant 0 : i32
    %c0_i32_1 = arith.constant 0 : i32
    return %arg2, %c0_i32, %c0_i32_0 : i32, i32, i32
  }
  func.func @transform_5(%arg0: i32, %arg1: i32, %arg2: i32) -> (i32, i32, i32) {
    %c0_i32 = arith.constant 0 : i32
    %c0_i32_0 = arith.constant 0 : i32
    %c0_i32_1 = arith.constant 0 : i32
    return %arg2, %c0_i32, %c0_i32_0 : i32, i32, i32
  }
  func.func @transform_6(%arg0: i32, %arg1: i32, %arg2: i32) -> (i32, i32, i32) {
    %c0_i32 = arith.constant 0 : i32
    %c0_i32_0 = arith.constant 0 : i32
    %c0_i32_1 = arith.constant 0 : i32
    return %arg2, %c0_i32, %c0_i32_0 : i32, i32, i32
  }
  func.func @transform_7(%arg0: i32, %arg1: i32, %arg2: i32) -> (i32, i32, i32, i32) {
    %c0_i32 = arith.constant 0 : i32
    %c0_i32_0 = arith.constant 0 : i32
    return %arg0, %arg2, %arg1, %c0_i32 : i32, i32, i32, i32
  }
  func.func @transform_8(%arg0: i32, %arg1: i32, %arg2: i32) -> (i32, i32, i32, i32) {
    %c0_i32 = arith.constant 0 : i32
    %c0_i32_0 = arith.constant 0 : i32
    return %arg0, %arg2, %arg1, %c0_i32 : i32, i32, i32, i32
  }
  func.func @transform_9(%arg0: i32, %arg1: i32, %arg2: i32) -> (i32, i32, i32, i32) {
    %c0_i32 = arith.constant 0 : i32
    %c0_i32_0 = arith.constant 0 : i32
    return %arg0, %arg2, %arg1, %c0_i32 : i32, i32, i32, i32
  }
}

</mosaic_0001>

<bundles_post_ra>
// kernel: tpu_custom_call.1
= control target key start
LH: loop header
LB: loop body
LE: loop exit
PB: predicated region body
PF: predicated region fallthrough
CT: control target
= control target key end

     0   :  { %s1654_s0 = inlined_call_operand.vmem [shape: f32[2,8,32], index: 0, kind: input, shape index: {}]   ;;  %s1655_s1 = inlined_call_operand.vmem [shape: f32[4,32,8], index: 1, kind: input, shape index: {}]   ;;  %s1656_s2 = inlined_call_operand.vmem [shape: f32[4,1,8], index: 2, kind: input, shape index: {}]   ;;  %s1657_s3 = inlined_call_operand.vmem [shape: f32[4,32,8], index: 3, kind: input, shape index: {}]   ;;  %s1658_s4 = inlined_call_operand.vmem [shape: f32[4,1,8], index: 4, kind: input, shape index: {}]   ;;  %s1659_s5 = inlined_call_operand.vmem [shape: f32[4,32,8], index: 5, kind: input, shape index: {}]   ;;  %s1660_s6 = inlined_call_operand.vmem [shape: f32[4,1,8], index: 6, kind: input, shape index: {}]   ;;  %s1661_s7 = inlined_call_operand.hbm [shape: f32[2,4,8,8], index: 7, kind: output, shape index: {0}]   ;;  %s1662_s8 = inlined_call_operand.hbm [shape: f32[2,4,8,8], index: 8, kind: output, shape index: {1}]   ;;  %s1663_s9 = inlined_call_operand.hbm [shape: f32[2,4,8,8], index: 9, kind: output, shape index: {2}]  }
   0x1   :  { %1670 = sst [smem:[#allocation14_spill]] %s1654_s0 }
   0x2   :  { %1671 = sst [smem:[#allocation15_spill]] %s1655_s1 }
   0x3   :  { %1672 = sst [smem:[#allocation16_spill]] %s1656_s2 }
   0x4   :  { %1673 = sst [smem:[#allocation17_spill]] %s1657_s3 }
   0x5   :  { %15 = vsyncpa [#allocation3], 0 }
   0x6   :  { %17 = vsyncpa [#allocation3 + $0x1], 0 }
   0x7   :  { %18 = vsyncpa [#allocation5], 0 }
   0x8   :  { %20 = vsyncpa [#allocation5 + $0x1], 0  ;;  %s1407_s30 = smov 0   ;;  %s1409_s10 = smov 0  }
   0x9   :  { %s1411_s11 = smov 0   ;;  %s1413_s12 = smov 0  }
   0xa   :  { %s1415_s13 = smov 0   ;;  %s1417_s14 = smov 0  }
   0xb   :  { %s1419_s15 = smov 0   ;;  %s1421_s16 = smov 0  }
   0xc LB: > { %1674 = sst [smem:[#allocation9_spill]] %s1341_s14  ;;  %s1665_s17 = sadd.s32 4294967295, %s1349_s16   ;;  %s1349_s16 = sphi %s1421_s16, %s26_s16   ;;  %s1345_s15 = sphi %s1419_s15, %s1691_s15   ;;  %s1341_s14 = sphi %s1417_s14, %s1690_s14   ;;  %s1337_s13 = sphi %s1415_s13, %s1689_s13   ;;  %s1333_s12 = sphi %s1413_s12, %s1688_s12   ;;  %s1329_s11 = sphi %s1411_s11, %s1694_s11   ;;  %s1325_s10 = sphi %s1409_s10, %s1693_s10   ;;  %s1321_s30 = sphi %s1407_s30, %s1692_s30  }
   0xd   : > { %1675 = sst [smem:[#allocation10_spill]] %s1345_s15  ;;  %s1664_s18 = sadd.s32 4294967294, %s1349_s16  }
   0xe   : > { %s38_s19 = sadd.s32 1, %s1341_s14  ;;  %s45_s20 = sadd.s32 1, %s1345_s15 }
   0xf   : > { %p39_p0 = scmp.ge.s32.totalorder %s38_s19, 4  ;;  %p250_p1 = scmp.ne.s32.totalorder %s1329_s11, %s1325_s10 }
  0x10   : > { %p251_p2 = scmp.eq.s32.totalorder %s1665_s17, 7  ;;  %p256_p5 = scmp.ne.s32.totalorder %s1325_s10, %s1321_s30 }
  0x11   : > { %s1696_s19 = smov (%p39_p0, %s38_s19), 0  ;;  %s1698_s20 = smov (!%p39_p0, %s45_s20), %s1345_s15 }
  0x12   : > { %1676 = sst [smem:[#allocation11_spill]] %s1696_s19  ;;  %s234_s21 = ssub.s32 %s1341_s14, %s1696_s19 }
  0x13   : > { %p1460_p3 = por %p251_p2, %p250_p1  ;;  %p47_p4 = scmp.ge.s32.totalorder %s1698_s20, 2 }
  0x14   : > { %p257_p6 = scmp.eq.s32.totalorder %s1664_s18, 7  ;;  %p1014_p7 = scmp.ge.s32.totalorder %s1349_s16, 1 }
  0x15   : > { %s1700_s20 = smov (%p47_p4, %s1698_s20), 0  ;;  %p387_p9 = scmp.lt.s32.totalorder %s1349_s16, 9 }
  0x16   : > { %1678 = sst [smem:[#allocation12_spill]] %s1700_s20  ;;  %p1471_p8 = por %p257_p6, %p256_p5 }
  0x17   : > { %s233_s24 = ssub.s32 %s1345_s15, %s1700_s20  ;;  %s240_s25 = sadd.s32 1, %s1329_s11 }
  0x18   : > { %s235_s26 = sor.u32 %s234_s21, %s233_s24  ;;  %p388_p10 = pnand %p1014_p7, %p387_p9 }
  0x19   : > { %p238_p11 = scmp.eq.s32.totalorder %s235_s26, 0  ;;  %p466_p12 = scmp.lt.s32.totalorder (!%p388_p10), %s1333_s12, 3  ;;  %v1351_v0 = vmov (!%p388_p10), 0.0|0.0   ;;  %vm1352_vm0 = vmmov (!%p388_p10), 0   ;;  %v1353_v1 = vmov (!%p388_p10), 0.0   ;;  %vm502_vm1 = vcmask (!%p388_p10), 261120  }
  0x1a   : > { %391 = sbr.rel (%p388_p10) target bundleno = 323 (0x143), region = 48  ;;  %p459_p13 = scmp.lt.s32.totalorder (!%p388_p10), %s1337_s13, 1  ;;  %1093 = vmatprep.subr.bf16.mxu0 (!%p388_p10), %v1351_v0  ;;  %1099 = vmatprep.subr.bf16.mxu1 (!%p388_p10), %v1351_v0  ;;  %vm738_vm2 = vcmask (!%p388_p10), 64512  }
  0x1b   : > { %s1480_s27 = scalar_select %p238_p11, %s1329_s11, %s240_s25  }
  0x1c   : > { %1068 = vmatprep.mubr.msk.f32.mxu0 (!%p388_p10), %vm1352_vm0, %v1353_v1  ;;  %1079 = vmatprep.mubr.msk.f32.mxu1 (!%p388_p10), %vm1352_vm0, %v1353_v1  ;;  %s1681_s1 = sld [smem:[#allocation15_spill]] (!%p388_p10)  ;;  %s1682_s3 = sld [smem:[#allocation17_spill]] (!%p388_p10) }
  0x1d   : > { %1680 = sst [smem:[#allocation13_spill]] %s1480_s27  ;;  %s442_s15 = sand.u32 (!%p388_p10), 1, %s1325_s10  }
  0x1e   : > { %s1683_s0 = sld [smem:[#allocation14_spill]] (!%p388_p10)  ;;  %s1034_s18 = sshll.u32 (!%p388_p10), %s1337_s13, 2 }
  0x1f   : > { %s1506_s19 = sshll.u32 (!%p388_p10), %s442_s15, 3  ;;  %s1684_s2 = sld [smem:[#allocation16_spill]] (!%p388_p10) }
  0x20   : > { %s1685_s25 = sadd.s32 (!%p388_p10), 4294967295, %s1349_s16  }
  0x21   : > { %s1485_s28 = scalar_select %p466_p12, %s1333_s12, 3 }
  0x22   : > { %s460_s29 = scalar_select %p459_p13, %s1337_s13, 1 }
  0x23   : > { %s1042_s21 = sshll.u32 %s1485_s28, 5  ;;  %s481_s24 = scalar_lea.vmem %s1658_s4, %s1485_s28 }
  0x24   : > { %s470_s26 = scalar_lea.vmem %s1681_s1, %s1042_s21  ;;  %s478_s20 = scalar_lea.vmem %s1682_s3, %s1042_s21  ;;  %v1027_v22 = vld [vmem:[%s481_s24] ss:$0 sm:$0xff] }
  0x25   : > { %v491_v2 = vld [vmem:[%s470_s26] sm:$0xff]  ;;  %v492_v3 = vld [vmem:[%s470_s26 + $0x8] sm:$0xff]  ;;  %v493_v4 = vld [vmem:[%s470_s26 + $0x10] sm:$0xff]  ;;  %s486_s14 = scalar_lea.vmem %s1659_s5, %s1042_s21  ;;  %s1018_s27 = sshll.u32 %s460_s29, 3 }
  0x26   : > { %v1094_v5 = vpack.c.bf16 %v492_v3, %v491_v2  ;;  %v494_v6 = vld [vmem:[%s470_s26 + $0x18] sm:$0xff]  ;;  %v576_v7 = vld [vmem:[%s478_s20] sm:$0xff]  ;;  %v577_v8 = vld [vmem:[%s478_s20 + $0x8] sm:$0xff]  ;;  %s465_s17 = scalar_lea.vmem %s1683_s0, %s1018_s27  ;;  %s473_s29 = scalar_lea.vmem %s1684_s2, %s1485_s28 }
  0x27   : > { %v1100_v9 = vpack.c.bf16 %v577_v8, %v576_v7  ;;  %v1097_v10 = vpack.c.bf16 %v494_v6, %v493_v4  ;;  %v578_v11 = vld [vmem:[%s478_s20 + $0x10] sm:$0xff]  ;;  %v579_v12 = vld [vmem:[%s478_s20 + $0x18] sm:$0xff]  ;;  %v657_v13 = vld [vmem:[%s486_s14] sm:$0xff]  ;;  %s444_s13 = scalar_lea.vmem [#allocation2], %s1506_s19  ;;  %s451_s20 = scalar_lea.vmem [#allocation4], %s1506_s19 }
  0x28   : > { %1095 = vmatpush3.bf16.msra.mxu0 %v1094_v5  ;;  %v658_v14 = vld [vmem:[%s486_s14 + $0x8] sm:$0xff]  ;;  %v1103_v15 = vpack.c.bf16 %v579_v12, %v578_v11  ;;  %v490_v16 = vld [vmem:[%s465_s17] sm:$0xff]  ;;  %v659_v18 = vld [vmem:[%s486_s14 + $0x10] sm:$0xff]  ;;  %s1519_s17 = sand.u32 1, %s1685_s25   ;;  %s769_s1 = sshll.u32 %s444_s13, 4  ;;  %s1531_s1 = int_to_ptr.vmem [resolvable:$true] %s769_s1 }
  0x29   : > { %1096 = vmatprep.subr.bf16.mxu0 %v1351_v0  ;;  %1101 = vmatpush3.bf16.msra.mxu1 %v1100_v9  ;;  %v1106_v17 = vpack.c.bf16 %v658_v14, %v657_v13  ;;  %v660_v19 = vld [vmem:[%s486_s14 + $0x18] sm:$0xff]  ;;  %s765_s14 = sadd.s32 %s1333_s12, %s1034_s18  ;;  %v1025_v21 = vld [vmem:[%s473_s29] ss:$0 sm:$0xff]  ;;  %s785_s27 = sshll.u32 %s451_s20, 4  ;;  %s1539_s27 = int_to_ptr.vmem [resolvable:$true] %s785_s27 }
  0x2a   : > { %1102 = vmatprep.subr.bf16.mxu1 %v1351_v0  ;;  %v1109_v20 = vpack.c.bf16 %v660_v19, %v659_v18  ;;  %s1521_s0 = sshll.u32 %s765_s14, 7  ;;  %s489_s12 = scalar_lea.vmem %s1660_s6, %s1485_s28 }
  0x2b   : > { %s1529_s29 = scalar_lea.hbm %s1661_s7, %s1521_s0  ;;  %s1537_s26 = scalar_lea.hbm %s1662_s8, %s1521_s0 }
  0x2c   : > { %1098 = vmatpush3.bf16.msra.mxu0 %v1097_v10  ;;  %s743_s18 = scalar_lea.sflag [#allocation3], %s442_s15  ;;  %s1195_s2 = scalar_lea.vmem %s1531_s1, 128 }
  0x2d   : > { %1105 = vmatprep.subr.bf16.mxu0 %v1351_v0  ;;  %1104 = vmatpush3.bf16.msra.mxu1 %v1103_v15  ;;  %p1196_p0 = scmp.ne.s32.totalorder %s1531_s1, %s1195_s2  ;;  %s1354_s3 = smov [#allocation2]  }
  0x2e   : > { %s1199_s14 = sshll.u32 %s1354_s3, 4  ;;  %s1200_s14 = int_to_ptr.vmem [resolvable:$false] %s1199_s14 }
  0x2f   : > { %1069 = vmatmul.mubr.msk.f32.vlgmr.msra.gmra.mrb[0].mxu0 %vm502_vm1, %v490_v16  ;;  %p1197_p1 = pnand %p1196_p0, %p1460_p3  ;;  %s1201_s21 = scalar_lea.vmem %s1200_s14, 256 }
  0x30   : > { %1107 = vmatpush3.bf16.msra.mxu0 %v1106_v17  ;;  %1080 = vmatmul.mubr.msk.f32.vlgmr.msra.gmra.mrb[0].mxu1 %vm502_vm1, %v490_v16  ;;  %p1202_p4 = scmp.lt.s32.totalorder %s1531_s1, %s1200_s14  ;;  %p1203_p5 = scmp.lt.s32.totalorder %s1201_s21, %s1195_s2 }
  0x31   : > { %1108 = vmatprep.subr.bf16.mxu0 %v1351_v0  ;;  %1090 = vmatprep.mubr.msk.f32.mxu0 %vm1352_vm0, %v1353_v1  ;;  %p1198_p2 = pneg %p1197_p1 }
  0x32   : > { %p1204_p6 = por %p1203_p5, %p1202_p4 }
  0x34   : > { %1110 = vmatpush3.bf16.msra.mxu0 %v1109_v20  ;;  %p1205_p7 = pnand %p1204_p6, %p1198_p2 }
  0x37   : > { %1091 = vmatmul.mubr.msk.f32.vlgmr.msra.gmra.mrb[2].mxu0 %vm502_vm1, %v490_v16 }
 0x102   : > { %v572_v23 = vpop.f32.mrb[0].mxu0 }
 0x103   : > { %v573_v24 = vadd.f32 %v1025_v21, %v572_v23  ;;  %v1070_v25 = vpop.f32.mrb[1].mxu0  ;;  %v653_v26 = vpop.f32.mrb[0].mxu1 }
 0x104   : > { %v654_v27 = vadd.f32 %v1027_v22, %v653_v26  ;;  %v1081_v28 = vpop.f32.mrb[1].mxu1 }
 0x105   : > { %739 = vst.msk [vmem:[%s444_s13] sm:$0xff] %vm738_vm2, %v573_v24 }
 0x106   : > { %740 = vst.msk [vmem:[%s451_s20] sm:$0xff] %vm738_vm2, %v654_v27 }
 0x107   : > { %1208 = shalt.err (!%p1205_p7)
}
 0x108   : > { %s1209_s15 = scalar_lea.hbm %s1529_s29, 128  ;;  %s1213_s3 = scalar_lea.hbm %s1661_s7, 1024 }
 0x109   : > { %p1210_p9 = scmp.ne.s32.totalorder %s1529_s29, %s1209_s15  ;;  %p1214_p12 = scmp.lt.u32.totalorder %s1529_s29, %s1661_s7 }
 0x10a   : > { %p1215_p13 = scmp.lt.u32.totalorder %s1213_s3, %s1209_s15  ;;  %p1217_p1 = scmp.lt.u32.totalorder %s1209_s15, %s1529_s29 }
 0x10b   : > { %p1211_p10 = pnand %p1210_p9, %p1460_p3 }
 0x10c   : > { %p1216_p0 = por %p1215_p13, %p1214_p12 }
 0x10d   : > { %p1212_p11 = pneg %p1211_p10 }
 0x10e   : > { %p1218_p2 = por %p1217_p1, %p1216_p0 }
 0x110   : > { %p1219_p4 = pnand %p1218_p2, %p1212_p11 }
 0x112   : > { %1222 = shalt.err (!%p1219_p4)
}
 0x113   : > { %1111 = dma.vmem_to_hbm [thread:$0]  (%p1460_p3), %s1531_s1, 128, %s1529_s29, %s743_s18  }
 0x114   : > { %s748_s2 = scalar_lea.sflag [#allocation5], %s1519_s17  ;;  %s1223_s14 = scalar_lea.vmem %s1539_s27, 128 }
 0x115   : > { %p1224_p5 = scmp.ne.s32.totalorder %s1539_s27, %s1223_s14  ;;  %s1355_s21 = smov [#allocation4]  }
 0x116   : > { %s1227_s15 = sshll.u32 %s1355_s21, 4  ;;  %s1228_s15 = int_to_ptr.vmem [resolvable:$false] %s1227_s15 }
 0x117   : > { %p1225_p6 = pnand %p1224_p5, %p1460_p3  ;;  %s1229_s13 = scalar_lea.vmem %s1228_s15, 256 }
 0x118   : > { %p1230_p9 = scmp.lt.s32.totalorder %s1539_s27, %s1228_s15  ;;  %p1231_p10 = scmp.lt.s32.totalorder %s1229_s13, %s1223_s14 }
 0x119   : > { %p1226_p7 = pneg %p1225_p6 }
 0x11a   : > { %p1232_p11 = por %p1231_p10, %p1230_p9 }
 0x11c   : > { %p1233_p12 = pnand %p1232_p11, %p1226_p7 }
 0x11e   : > { %1236 = shalt.err (!%p1233_p12)
}
 0x11f   : > { %s1237_s1 = scalar_lea.hbm %s1537_s26, 128  ;;  %s1241_s20 = scalar_lea.hbm %s1662_s8, 1024 }
 0x120   : > { %p1238_p13 = scmp.ne.s32.totalorder %s1537_s26, %s1237_s1  ;;  %p1242_p2 = scmp.lt.u32.totalorder %s1537_s26, %s1662_s8 }
 0x121   : > { %p1243_p4 = scmp.lt.u32.totalorder %s1241_s20, %s1237_s1  ;;  %p1245_p6 = scmp.lt.u32.totalorder %s1237_s1, %s1537_s26 }
 0x122   : > { %p1239_p0 = pnand %p1238_p13, %p1460_p3 }
 0x123   : > { %p1244_p5 = por %p1243_p4, %p1242_p2 }
 0x124   : > { %p1240_p1 = pneg %p1239_p0 }
 0x125   : > { %p1246_p7 = por %p1245_p6, %p1244_p5 }
 0x127   : > { %p1247_p9 = pnand %p1246_p7, %p1240_p1 }
 0x129   : > { %1250 = shalt.err (!%p1247_p9)
}
 0x12a   : > { %1112 = dma.vmem_to_hbm [thread:$0]  (%p1460_p3), %s1539_s27, 128, %s1537_s26, %s748_s2   ;;  %v1029_v29 = vld [vmem:[%s489_s12] ss:$0 sm:$0xff]  ;;  %v734_v30 = vpop.f32.mrb[2].mxu0 }
 0x12b   : > { %s458_s21 = scalar_lea.vmem [#allocation6], %s1506_s19  ;;  %v735_v31 = vadd.f32 %v1029_v29, %v734_v30  ;;  %v1092_v32 = vpop.f32.mrb[3].mxu0  ;;  %s1602_s29 = scalar_lea.hbm %s1663_s9, %s1521_s0 }
 0x12c   : > { %s801_s15 = sshll.u32 %s458_s21, 4  ;;  %s1356_s28 = smov [#allocation6]   ;;  %s802_s15 = int_to_ptr.vmem [resolvable:$true] %s801_s15 }
 0x12d   : > { %741 = vst.msk [vmem:[%s458_s21] sm:$0xff] %vm738_vm2, %v735_v31  ;;  %s1251_s18 = scalar_lea.vmem %s802_s15, 128  ;;  %s1255_s27 = sshll.u32 %s1356_s28, 4  ;;  %s1256_s27 = int_to_ptr.vmem [resolvable:$false] %s1255_s27 }
 0x12e   : > { %p1252_p10 = scmp.ne.s32.totalorder %s802_s15, %s1251_s18  ;;  %s1257_s19 = scalar_lea.vmem %s1256_s27, 256 }
 0x12f   : > { %p1258_p13 = scmp.lt.s32.totalorder %s802_s15, %s1256_s27  ;;  %p1259_p0 = scmp.lt.s32.totalorder %s1257_s19, %s1251_s18 }
 0x130   : > { %p1253_p11 = pnand %p1252_p10, %p1460_p3 }
 0x131   : > { %p1260_p1 = por %p1259_p0, %p1258_p13 }
 0x132   : > { %p1254_p12 = pneg %p1253_p11 }
 0x134   : > { %p1261_p2 = pnand %p1260_p1, %p1254_p12 }
 0x136   : > { %1264 = shalt.err (!%p1261_p2)
}
 0x137   : > { %s1265_s0 = scalar_lea.hbm %s1602_s29, 128  ;;  %s1269_s20 = scalar_lea.hbm %s1663_s9, 1024 }
 0x138   : > { %p1266_p4 = scmp.ne.s32.totalorder %s1602_s29, %s1265_s0  ;;  %p1270_p7 = scmp.lt.u32.totalorder %s1602_s29, %s1663_s9 }
 0x139   : > { %p1271_p9 = scmp.lt.u32.totalorder %s1269_s20, %s1265_s0  ;;  %p1273_p11 = scmp.lt.u32.totalorder %s1265_s0, %s1602_s29 }
 0x13a   : > { %p1267_p5 = pnand %p1266_p4, %p1460_p3 }
 0x13b   : > { %p1272_p10 = por %p1271_p9, %p1270_p7 }
 0x13c   : > { %p1268_p6 = pneg %p1267_p5 }
 0x13d   : > { %p1274_p12 = por %p1273_p11, %p1272_p10 }
 0x13f   : > { %p1275_p13 = pnand %p1274_p12, %p1268_p6 }
 0x141   : > { %1278 = shalt.err (!%p1275_p13)
}
 0x142   : > { %1113 = dma.vmem_to_hbm [thread:$0]  (%p1460_p3), %s802_s15, 128, %s1602_s29, %s748_s2  }
 0x143 PF: > { %p1127_p0 = scmp.ge.s32.totalorder %s1349_s16, 2  ;;  %s813_s25 = sand.u32 1, %s1321_s30  }
 0x144   : > { %s814_s14 = scalar_lea.sflag [#allocation3], %s813_s25 }
 0x145   : > { %p1118_p1 = pnand %p1127_p0, %p1471_p8 }
 0x147   : > { %1312 = dma.done.wait (!%p1118_p1), %s814_s14, 128  }
 0x148   : > { %1314 = vsyncadd (!%p1118_p1), %s814_s14, 4294967168  ;;  %s1686_s21 = sadd.s32 4294967294, %s1349_s16  }
 0x149   : > { %s822_s13 = sand.u32 1, %s1686_s21  }
 0x14a   : > { %s823_s1 = scalar_lea.sflag [#allocation5], %s822_s13 }
 0x14b   : > { %1316 = dma.done.wait (!%p1118_p1), %s823_s1, 256  }
 0x14c   : > { %1318 = vsyncadd (!%p1118_p1), %s823_s1, 4294967040  ;;  %s26_s16 = sadd.s32 1, %s1349_s16   ;;  %s1687_s22 = sld [smem:[#allocation13_spill]] }
 0x14d   : > { %p23_p3 = scmp.ge.s32.totalorder %s26_s16, 10   ;;  %s1688_s12 = sld [smem:[#allocation9_spill]] }
 0x14e   : > { %s1689_s13 = sld [smem:[#allocation10_spill]]  ;;  %s1690_s14 = sld [smem:[#allocation11_spill]] }
 0x14f   : > { %s1691_s15 = sld [smem:[#allocation12_spill]]  ;;  %s1692_s30 = smov %s1325_s10 }
 0x150   : > { %s1693_s10 = smov %s1329_s11  ;;  %25 = sbr.rel (!%p23_p3) target bundleno = 12 (0xc), region = 133 }
 0x152   : > { %s1694_s11 = smov %s1687_s22 }
 0x157   :  { %837 = vsyncpa [#allocation3], 1 }
 0x158   :  { %839 = vsyncpa [#allocation3 + $0x1], 1 }
 0x159   :  { %840 = vsyncpa [#allocation5], 1 }
 0x15a   :  { %842 = vsyncpa [#allocation5 + $0x1], 1 }

</bundles_post_ra>
